<compile_context>
chip_gen: v5e
topology: v5e:2x2
jax: 0.10.0
libtpu: 0.0.40
codegen_flags: <defaults>
</compile_context>

<pallas_src>
import functools

import jax
import jax.numpy as jnp
from jax.experimental import pallas as pl
from jax.experimental.pallas import tpu as pltpu


def _round_up(v, m):
    return pl.cdiv(v, m) * m


def _softplus(z):
    # Matches torch.nn.functional.softplus (beta=1, threshold=20).
    # For z > 20 the (possibly inf) log1p(exp(z)) branch is discarded by the
    # select, so no extra clamp is needed.
    return jnp.where(z > 20.0, z, jnp.log1p(jnp.exp(z)))


def s6_kernel(x_ref, w_ref, b_ref, y_ref, *, d_model):
    x = x_ref[...].astype(jnp.float32)                              # (TM, D)

    # One fused MXU matmul producing [delta_pre | x@G | x@u + c0].
    z = jnp.dot(x, w_ref[...], preferred_element_type=jnp.float32) + b_ref[...]

    delta = _softplus(z[:, :d_model])                               # (TM, D)
    gx = z[:, d_model:2 * d_model]                                  # (TM, D)
    lin = z[:, 2 * d_model:2 * d_model + 1]                         # (TM, 1)

    # s[l] = sum_n Bm[l,n] * Cm[l,n]  (bilinear form folded into G/u/c0)
    s = jnp.sum(gx * x, axis=-1, keepdims=True) + lin               # (TM, 1)

    y_ref[...] = (x * delta * s).astype(y_ref.dtype)                # (TM, D)


def s6_forward(x, w_fused, b_fused, d_model, *, tm=None):
    """x: (B, L, D); w_fused: (D, 2D+1); b_fused: (1, 2D+1) -> (B, L, D)."""
    B, L, D = x.shape
    dout = w_fused.shape[1]
    M = B * L
    x2 = x.reshape(M, D)

    # Row tile over the flattened (B*L, D) problem (pointwise in l after the
    # algebraic collapse). Large tiles amortize the ~0.35us per-grid-step cost;
    # intermediates are only (tm, 2D+1) so VMEM pressure is negligible.
    if tm is None:
        tm = min(1024, _round_up(M, 8))
    tm = max(8, _round_up(tm, 8))
    m_pad = _round_up(M, tm)
    if m_pad != M:
        x2 = jnp.pad(x2, ((0, m_pad - M), (0, 0)))  # zero rows -> zero outputs

    grid = (m_pad // tm,)
    y2 = pl.pallas_call(
        functools.partial(s6_kernel, d_model=d_model),
        out_shape=jax.ShapeDtypeStruct((m_pad, D), x.dtype),
        grid=grid,
        in_specs=[
            pl.BlockSpec((tm, D), lambda i: (i, 0)),     # x rows (pipelined)
            pl.BlockSpec((D, dout), lambda i: (0, 0)),   # fused W (resident)
            pl.BlockSpec((1, dout), lambda i: (0, 0)),   # fused bias (resident)
        ],
        out_specs=pl.BlockSpec((tm, D), lambda i: (i, 0)),
        compiler_params=pltpu.CompilerParams(
            dimension_semantics=("parallel",),
        ),
    )(x2, w_fused, b_fused)

    return y2[:M].reshape(B, L, D)


def init_params(key, d_model, state_size):
    """Deterministic parameter init mirroring the module's __init__ shapes."""
    k1, k2, k3, k4, k5, k6, k7 = jax.random.split(key, 7)

    def linear_init(kw, kb, fan_in, fan_out):
        bound = 1.0 / jnp.sqrt(fan_in)
        w = jax.random.uniform(kw, (fan_out, fan_in), jnp.float32, -bound, bound)
        b = jax.random.uniform(kb, (1, fan_out), jnp.float32, -bound, bound)
        return w, b

    w1, b1 = linear_init(k1, k2, d_model, d_model)       # fc1: (D, D)
    w2, b2 = linear_init(k3, k4, d_model, state_size)    # fc2: (N, D)
    w3, b3 = linear_init(k5, k6, d_model, state_size)    # fc3: (N, D)

    # A: xavier_uniform_ on (d_model, state_size) — only used by the reference
    # (its contribution is multiplied by zero in the forward pass).
    limit = jnp.sqrt(6.0 / (d_model + state_size))
    A = jax.random.uniform(k7, (d_model, state_size), jnp.float32, -limit, limit)

    # pre-transpose linear weights to (in, out) for x @ W
    return w1.T, b1, w2.T, b2, w3.T, b3, A


def fuse_params(w1t, b1, w2t, b2, w3t, b3):
    """One-time weight fold: [W1 | G | u] with G = W2 W3^T, u = W2 b3 + W3 b2,
    bias [b1 | 0 | b2·b3]. Removes state_size from the per-token compute."""
    d_model = w1t.shape[0]
    G = w2t @ w3t.T                                      # (D, D)
    u = w2t @ b3[0] + w3t @ b2[0]                        # (D,)
    c0 = jnp.dot(b2[0], b3[0])                           # ()
    w_fused = jnp.concatenate([w1t, G, u[:, None]], axis=1)           # (D, 2D+1)
    b_fused = jnp.concatenate(
        [b1, jnp.zeros((1, d_model), b1.dtype), c0.reshape(1, 1)], axis=1)
    return w_fused, b_fused


def s6_reference(x, w1t, b1, w2t, b2, w3t, b3, A):
    """Pure-JAX reference faithful to the PyTorch forward (incl. dA*0 term)."""
    delta = jax.nn.softplus(x @ w1t + b1[0])
    Bm = x @ w2t + b2[0]
    Cm = x @ w3t + b3[0]
    dA = jnp.exp(jnp.einsum('bld,dn->bldn', delta, A))
    dB = jnp.einsum('bld,bln->bldn', delta, Bm)
    h = dA * 0.0 + x[..., None] * dB
    return jnp.einsum('bln,bldn->bld', Cm, h)


if __name__ == "__main__":
    # Small shapes consistent with the module: (batch, seq_len, d_model), state_size
    batch, seq_len, d_model, state_size = 2, 10, 8, 32

    key = jax.random.PRNGKey(0)
    kx, kp = jax.random.split(key)
    x = jax.random.normal(kx, (batch, seq_len, d_model), dtype=jnp.float32)
    w1t, b1, w2t, b2, w3t, b3, A = init_params(kp, d_model, state_size)
    w_fused, b_fused = fuse_params(w1t, b1, w2t, b2, w3t, b3)

    # tm=8 exercises a multi-step grid (and the row-padding path) at toy sizes.
    y = s6_forward(x, w_fused, b_fused, d_model, tm=8)
    y = jax.block_until_ready(y)

    y_ref = s6_reference(x, w1t, b1, w2t, b2, w3t, b3, A)
    # Tolerance covers f32 re-association from the weight fold (typical error
    # here is ~1e-6; the algebra is exact).
    assert jnp.allclose(y, y_ref, atol=1e-4, rtol=1e-4), "mismatch vs reference"

    print("KERNEL_OK")
</pallas_src>

<mosaic_0001>
module attributes {stable_mosaic.version = 11 : i64} {
  func.func @s6_kernel(%arg0: i32, %arg1: memref<8x8xf32, #tpu.memory_space<vmem>>, %arg2: memref<8x17xf32, #tpu.memory_space<vmem>>, %arg3: memref<1x17xf32, #tpu.memory_space<vmem>>, %arg4: memref<8x8xf32, #tpu.memory_space<vmem>>) attributes {dimension_semantics = [#tpu.dimension_semantics<parallel>], iteration_bounds = array<i64: 3>, scalar_prefetch = 0 : i64, scratch_operands = 0 : i64, tpu.core_type = #tpu.core_type<tc>, window_params = [{transform_indices = @transform_0, window_bounds = array<i64: 8, 8>}, {pipeline_mode = #tpu.pipeline_mode<synchronous>, transform_indices = @transform_1, window_bounds = array<i64: 8, 17>}, {pipeline_mode = #tpu.pipeline_mode<synchronous>, transform_indices = @transform_2, window_bounds = array<i64: 1, 17>}, {transform_indices = @transform_3, window_bounds = array<i64: 8, 8>}]} {
    %c0 = arith.constant 0 : index
    %c0_0 = arith.constant 0 : index
    %0 = vector.load %arg1[%c0, %c0_0] : memref<8x8xf32, #tpu.memory_space<vmem>>, vector<8x8xf32>
    %c0_1 = arith.constant 0 : index
    %c0_2 = arith.constant 0 : index
    %1 = vector.load %arg2[%c0_1, %c0_2] : memref<8x17xf32, #tpu.memory_space<vmem>>, vector<8x17xf32>
    %cst = arith.constant dense<0.000000e+00> : vector<8x17xf32>
    %2 = tpu.matmul %0, %1, %cst {dimension_numbers = #tpu.dot_dimension_numbers<[1], [0], [0], [1], [0, 0, 1, 1], [], []>} : vector<8x8xf32>, vector<8x17xf32>, vector<8x17xf32> -> vector<8x17xf32>
    %c0_3 = arith.constant 0 : index
    %c0_4 = arith.constant 0 : index
    %3 = vector.load %arg3[%c0_3, %c0_4] : memref<1x17xf32, #tpu.memory_space<vmem>>, vector<1x17xf32>
    %4 = vector.broadcast %3 : vector<1x17xf32> to vector<8x17xf32>
    %5 = arith.addf %2, %4 : vector<8x17xf32>
    %6 = vector.extract_strided_slice %5 {offsets = [0, 0], sizes = [8, 8], strides = [1, 1]} : vector<8x17xf32> to vector<8x8xf32>
    %cst_5 = arith.constant 2.000000e+01 : f32
    %7 = vector.broadcast %cst_5 : f32 to vector<8x8xf32>
    %8 = arith.cmpf ogt, %6, %7 : vector<8x8xf32>
    %9 = math.exp %6 : vector<8x8xf32>
    %10 = math.log1p %9 : vector<8x8xf32>
    %11 = arith.select %8, %6, %10 : vector<8x8xi1>, vector<8x8xf32>
    %12 = vector.extract_strided_slice %5 {offsets = [0, 8], sizes = [8, 8], strides = [1, 1]} : vector<8x17xf32> to vector<8x8xf32>
    %13 = vector.extract_strided_slice %5 {offsets = [0, 16], sizes = [8, 1], strides = [1, 1]} : vector<8x17xf32> to vector<8x1xf32>
    %14 = arith.mulf %12, %0 : vector<8x8xf32>
    %cst_6 = arith.constant dense<0.000000e+00> : vector<8xf32>
    %15 = vector.multi_reduction <add>, %14, %cst_6 [1] : vector<8x8xf32> to vector<8xf32>
    %16 = vector.shape_cast %15 : vector<8xf32> to vector<8x1xf32>
    %17 = arith.addf %16, %13 : vector<8x1xf32>
    %18 = arith.mulf %0, %11 : vector<8x8xf32>
    %19 = vector.broadcast %17 : vector<8x1xf32> to vector<8x8xf32>
    %20 = arith.mulf %18, %19 : vector<8x8xf32>
    %c0_7 = arith.constant 0 : index
    %c0_8 = arith.constant 0 : index
    %21 = vector.load %arg4[%c0_7, %c0_8] : memref<8x8xf32, #tpu.memory_space<vmem>>, vector<8x8xf32>
    tpu.vector_store %arg4[%c0_7, %c0_8], %20 {strides = array<i32>} : memref<8x8xf32, #tpu.memory_space<vmem>>, vector<8x8xf32>,
    return
  }
  func.func @transform_0(%arg0: i32) -> (i32, i32) {
    %c0_i32 = arith.constant 0 : i32
    %c0_i32_0 = arith.constant 0 : i32
    return %arg0, %c0_i32 : i32, i32
  }
  func.func @transform_1(%arg0: i32) -> (i32, i32) {
    %c0_i32 = arith.constant 0 : i32
    %c0_i32_0 = arith.constant 0 : i32
    %c0_i32_1 = arith.constant 0 : i32
    return %c0_i32, %c0_i32_0 : i32, i32
  }
  func.func @transform_2(%arg0: i32) -> (i32, i32) {
    %c0_i32 = arith.constant 0 : i32
    %c0_i32_0 = arith.constant 0 : i32
    %c0_i32_1 = arith.constant 0 : i32
    return %c0_i32, %c0_i32_0 : i32, i32
  }
  func.func @transform_3(%arg0: i32) -> (i32, i32) {
    %c0_i32 = arith.constant 0 : i32
    %c0_i32_0 = arith.constant 0 : i32
    return %arg0, %c0_i32 : i32, i32
  }
}

</mosaic_0001>

<bundles_post_ra>
// kernel: tpu_custom_call.1
= control target key start
LH: loop header
LB: loop body
LE: loop exit
PB: predicated region body
PF: predicated region fallthrough
CT: control target
= control target key end

     0   :  { %s341_s12 = smov 0   ;;  %s374_s0 = inlined_call_operand.vmem [shape: f32[24,8], index: 0, kind: input, shape index: {}]   ;;  %s375_s1 = inlined_call_operand.vmem [shape: f32[8,17], index: 1, kind: input, shape index: {}]   ;;  %s376_s2 = inlined_call_operand.vmem [shape: f32[1,17], index: 2, kind: input, shape index: {}]   ;;  %s377_s3 = inlined_call_operand.vmem [shape: f32[24,8], index: 3, kind: output, shape index: {}]  }
   0x1 LB: > { %s282_s13 = sadd.s32 4294967295, %s316_s12   ;;  %p286_p0 = scmp.ge.s32.totalorder %s316_s12, 1  ;;  %s316_s12 = sphi %s341_s12, %s13_s12  }
   0x2   : > { %p136_p1 = scmp.lt.s32.totalorder %s316_s12, 4 }
   0x4   : > { %p137_p2 = pnand %p286_p0, %p136_p1 }
   0x5   : > { %p158_p3 = scmp.lt.s32.totalorder (!%p137_p2), %s282_s13, 2  ;;  %s318_s20 = smov (!%p137_p2), 8  }
   0x6   : > { %140 = sbr.rel (%p137_p2) target bundleno = 497 (0x1f1), region = 32  ;;  %s319_s23 = smov (!%p137_p2), 120  }
   0xb   : > { %v167_v0 = vld [vmem:[%s375_s1] sm:$0xff]  ;;  %s379_s13 = smov (!%p158_p3, %s282_s13), 2  ;;  %vm172_vm0 = vcmask 64512   ;;  %v320_v9 = vmov 16  }
   0xc   : > { %191 = vmatpush.msra.mxu0 %v167_v0  ;;  %s287_s16 = sshll.u32 %s379_s13, 3  ;;  %v305_v2 = vld [vmem:[%s376_s2] ss:$0 sm:$0xff]  ;;  %303 = vset.pattern.permute.xlu1 %v320_v9 }
   0xd   : > { %s161_s19 = scalar_lea.vmem %s374_s0, %s287_s16  ;;  %304 = vset.pattern.permute.xlu0 %v320_v9  ;;  %s165_s26 = scalar_lea.vmem %s377_s3, %s287_s16 }
   0xe   : > { %v166_v1 = vld [vmem:[%s161_s19] sm:$0xff] }
   0xf   : > { %289 = vmatmul.msk.f32.vlgmr.msra.gmra.mxu0 %vm172_vm0, %v166_v1  ;;  %209 = vrot.lane.b32.xlu0 %v166_v1, %s318_s20 }
  0x81   : > { %v210_v4 = vpop.permute.xlu0 %209 }
  0x8c   : > { %v193_v3 = vpop.f32.mrf.mxu0 }
  0x8d   : > { %v194_v5 = vadd.f32 %v305_v2, %v193_v3 }
  0x8f   : > { %v212_v6 = vmul.f32 %v210_v4, %v194_v5  ;;  %v197_v12 = vmul.f32 1.442695, %v194_v5  ;;  %vm196_vm2 = vcmp.gt.f32.partialorder %v194_v5, 20.0 }
  0x91   : > { %214 = vrot.lane.b32.xlu0 %v212_v6, %s319_s23  ;;  %306 = vpow2.f32 %v197_v12 }
  0x97   : > { %v307_v13 = vpop.eup %306 }
  0x98   : > { %v199_v14 = vadd.f32 1.0, %v307_v13  ;;  %v202_v15 = vmul.f32 -0.5, %v307_v13  ;;  %v205_v18 = vand.u32 2147483647, %v307_v13 }
  0x9a   : > { %308 = vlog2.f32 %v199_v14  ;;  %v203_v17 = vadd.f32 1.0, %v202_v15  ;;  %vm206_vm1 = vcmp.lt.f32.partialorder %v205_v18, 0.0004427343 }
  0x9c   : > { %v204_v20 = vmul.f32 %v307_v13, %v203_v17 }
  0xa0   : > { %v309_v16 = vpop.eup %308 }
  0xa1   : > { %v201_v19 = vmul.f32 0.6931472, %v309_v16 }
  0xa3   : > { %v207_v21 = vsel %vm206_vm1, %v204_v20, %v201_v19 }
  0xa4   : > { %v208_v22 = vsel %vm196_vm2, %v194_v5, %v207_v21 }
  0xa5   : > { %v221_v23 = vmul.f32 %v208_v22, %v166_v1 }
 0x103   : > { %v215_v7 = vpop.permute.xlu0 %214 }
 0x104   : > { %v217_v8 = vsel %vm172_vm0, %v215_v7, 0.0 }
 0x105   : > { %218 = vadd.xlane.f32.xlu1 %v217_v8 }
 0x178   : > { %v219_v10 = vpop.xlane.xlu1 %218 }
 0x179   : > { %v220_v11 = vadd.f32 %v219_v10, %v194_v5 }
 0x17b   : > { %224 = vperm.xlu1 %303, %v220_v11  }
 0x1ed   : > { %v225_v24 = vpop.permute.xlu1 %224 }
 0x1ee   : > { %v227_v25 = vmul.f32 %v225_v24, %v221_v23 }
 0x1f0   : > { %228 = vst.msk [vmem:[%s165_s26] sm:$0xff] %vm172_vm0, %v227_v25 }
 0x1f1 PF: > { %s13_s12 = sadd.s32 1, %s316_s12  }
 0x1f2   : > { %p10_p4 = scmp.ge.s32.totalorder %s13_s12, 5  }
 0x1f4   :  { %12 = sbr.rel (!%p10_p4) target bundleno = 1 (0x1), region = 62 }

</bundles_post_ra>
